<compile_context>
chip_gen: v6e
topology: v6e:2x2x1
jax: 0.10.0
libtpu: 0.0.40
codegen_flags: <defaults>
</compile_context>

<pallas_src>
import functools

import jax
import jax.numpy as jnp
import numpy as np
from jax import lax
from jax.experimental import pallas as pl
from jax.experimental.pallas import tpu as pltpu

MATMUL_DTYPE = jnp.float32


def _tap_masks(H, W):
    """(9, H*W) f32 validity masks for the 3x3 taps of a padding=1 conv."""
    yy, xx = np.meshgrid(np.arange(H), np.arange(W), indexing="ij")
    rows = []
    for dy in (-1, 0, 1):
        for dx in (-1, 0, 1):
            valid = ((yy + dy >= 0) & (yy + dy < H) &
                     (xx + dx >= 0) & (xx + dx < W))
            rows.append(valid.reshape(-1))
    return jnp.asarray(np.stack(rows).astype(np.float32))


def _im2col_taps(x, mask9, H, W):
    """x: (C, H*W). Returns the 3x3/padding=1 im2col slab (9*C, H*W).

    Each tap is a lane rotation of the flattened image (XLU) multiplied by a
    constant 0/1 boundary mask, so no padded scratch or gather is needed.
    Row ordering of the result is k = ((dy+1)*3 + (dx+1)) * C + c.
    """
    HW = H * W
    cols = []
    t = 0
    for dy in (-1, 0, 1):
        for dx in (-1, 0, 1):
            s = dy * W + dx
            if s == 0:                       # center tap: always valid
                cols.append(x)
            else:
                shifted = pltpu.roll(x, shift=(-s) % HW, axis=1)
                cols.append(shifted * mask9[t:t + 1, :])
            t += 1
    return jnp.concatenate(cols, axis=0)     # (9*C, H*W)


def gated_arma_kernel(x_ref, mask_ref, w1_ref, b1_ref, w2_ref, b2_ref, o_ref,
                      *, Cout, H, W):
    m9 = mask_ref[...]                       # (9, HW)
    x = x_ref[...]                           # (Cin, HW)

    # ---- layer 1, both branches fused: one (2C, 9*Cin) x (9*Cin, HW) matmul
    p1 = _im2col_taps(x, m9, H, W)
    h1 = jnp.dot(w1_ref[...].astype(MATMUL_DTYPE), p1.astype(MATMUL_DTYPE),
                 preferred_element_type=jnp.float32)
    h1 = jnp.maximum(h1 + b1_ref[...], 0.0)  # (2C, HW), ReLU

    # ---- layer 2, block-diagonal fused weight: one (2C, 18C) x (18C, HW)
    p2 = _im2col_taps(h1, m9, H, W)
    y2 = jnp.dot(w2_ref[...].astype(MATMUL_DTYPE), p2.astype(MATMUL_DTYPE),
                 preferred_element_type=jnp.float32)
    y2 = jnp.maximum(y2 + b2_ref[...], 0.0)  # (2C, HW), ReLU

    conv = y2[:Cout, :]
    mask = y2[Cout:, :]
    g = conv * jax.nn.sigmoid(mask)
    o_ref[...] = jnp.where(g >= 0.0, g, 0.2 * g)   # LeakyReLU(0.2)


def gated_arma_conv2d(x_nchw, params):
    """params: dict with w1a/b1a/w1b/b1b (conv branch), w2a/b2a/w2b/b2b (mask).

    Weights are HWIO (3, 3, Cin, Cout); x is NCHW like PyTorch.
    """
    x = x_nchw.astype(jnp.float32)
    B, Cin, H, W = x.shape
    HW = H * W
    Cout = params["w1a"].shape[-1]
    C2 = 2 * Cout

    x_flat = x.reshape(B, Cin, HW)                       # free reshape (NCHW)

    # Fused layer-1 weight: (2*Cout, 9*Cin), K ordered (ky, kx, ci).
    w_cat = jnp.concatenate([params["w1a"], params["w2a"]], axis=-1)
    W1 = jnp.transpose(w_cat, (3, 0, 1, 2)).reshape(C2, 9 * Cin)
    b1 = jnp.concatenate([params["b1a"], params["b2a"]]).reshape(C2, 1)

    # Fused block-diagonal layer-2 weight: (2*Cout, 9*2*Cout).
    w2_full = jnp.zeros((3, 3, C2, C2), jnp.float32)
    w2_full = w2_full.at[:, :, :Cout, :Cout].set(params["w1b"])
    w2_full = w2_full.at[:, :, Cout:, Cout:].set(params["w2b"])
    W2 = jnp.transpose(w2_full, (3, 0, 1, 2)).reshape(C2, 9 * C2)
    b2 = jnp.concatenate([params["b1b"], params["b2b"]]).reshape(C2, 1)

    mask9 = _tap_masks(H, W)                             # (9, HW) f32

    kernel = functools.partial(gated_arma_kernel, Cout=Cout, H=H, W=W)

    def resident(shape):
        n = len(shape)
        return pl.BlockSpec(shape, lambda b, _n=n: (0,) * _n)

    out_flat = pl.pallas_call(
        kernel,
        out_shape=jax.ShapeDtypeStruct((B, Cout, HW), jnp.float32),
        grid_spec=pltpu.PrefetchScalarGridSpec(
            num_scalar_prefetch=0,
            grid=(B,),
            in_specs=[
                pl.BlockSpec((pl.Squeezed(), Cin, HW), lambda b: (b, 0, 0)),
                resident((9, HW)),
                resident((C2, 9 * Cin)), resident((C2, 1)),
                resident((C2, 9 * C2)), resident((C2, 1)),
            ],
            out_specs=pl.BlockSpec((pl.Squeezed(), Cout, HW),
                                   lambda b: (b, 0, 0)),
        ),
        compiler_params=pltpu.CompilerParams(
            dimension_semantics=("parallel",)),
    )(x_flat, mask9, W1, b1, W2, b2)

    return out_flat.reshape(B, Cout, H, W)               # free reshape (NCHW)


# ---------------- pure-JAX reference (for correctness check) ----------------
def _conv3x3_ref(x, w, b):
    y = lax.conv_general_dilated(x, w, (1, 1), "SAME",
                                 dimension_numbers=("NHWC", "HWIO", "NHWC"))
    return y + b.reshape(1, 1, 1, -1)


def reference(x_nchw, p):
    x = jnp.transpose(x_nchw, (0, 2, 3, 1)).astype(jnp.float32)
    h = jax.nn.relu(_conv3x3_ref(x, p["w1a"], p["b1a"]))
    conv = jax.nn.relu(_conv3x3_ref(h, p["w1b"], p["b1b"]))
    h = jax.nn.relu(_conv3x3_ref(x, p["w2a"], p["b2a"]))
    mask = jax.nn.relu(_conv3x3_ref(h, p["w2b"], p["b2b"]))
    g = conv * jax.nn.sigmoid(mask)
    y = jnp.where(g >= 0.0, g, 0.2 * g)
    return jnp.transpose(y, (0, 3, 1, 2))


if __name__ == "__main__":
    B, Cin, Cout, H, W = 2, 4, 8, 16, 16
    key = jax.random.PRNGKey(0)
    ks = jax.random.split(key, 9)
    params = {
        "w1a": 0.1 * jax.random.normal(ks[0], (3, 3, Cin, Cout), jnp.float32),
        "b1a": 0.1 * jax.random.normal(ks[1], (Cout,), jnp.float32),
        "w1b": 0.1 * jax.random.normal(ks[2], (3, 3, Cout, Cout), jnp.float32),
        "b1b": 0.1 * jax.random.normal(ks[3], (Cout,), jnp.float32),
        "w2a": 0.1 * jax.random.normal(ks[4], (3, 3, Cin, Cout), jnp.float32),
        "b2a": 0.1 * jax.random.normal(ks[5], (Cout,), jnp.float32),
        "w2b": 0.1 * jax.random.normal(ks[6], (3, 3, Cout, Cout), jnp.float32),
        "b2b": 0.1 * jax.random.normal(ks[7], (Cout,), jnp.float32),
    }
    x = jax.random.normal(ks[8], (B, Cin, H, W), jnp.float32)  # NCHW like PyTorch

    out = jax.block_until_ready(gated_arma_conv2d(x, params))
    assert out.shape == (B, Cout, H, W)

    ref = reference(x, params)
    np.testing.assert_allclose(np.asarray(out), np.asarray(ref),
                               rtol=1e-4, atol=1e-5)
    print("KERNEL_OK")
</pallas_src>

<mosaic_0001>
module attributes {stable_mosaic.version = 11 : i64} {
  func.func @gated_arma_kernel(%arg0: i32, %arg1: memref<1x4x256xf32, #tpu.memory_space<vmem>>, %arg2: memref<9x256xf32, #tpu.memory_space<vmem>>, %arg3: memref<16x36xf32, #tpu.memory_space<vmem>>, %arg4: memref<16x1xf32, #tpu.memory_space<vmem>>, %arg5: memref<16x144xf32, #tpu.memory_space<vmem>>, %arg6: memref<16x1xf32, #tpu.memory_space<vmem>>, %arg7: memref<1x8x256xf32, #tpu.memory_space<vmem>>) attributes {dimension_semantics = [#tpu.dimension_semantics<parallel>], iteration_bounds = array<i64: 2>, scalar_prefetch = 0 : i64, scratch_operands = 0 : i64, tpu.core_type = #tpu.core_type<tc>, window_params = [{transform_indices = @transform_0, window_bounds = array<i64: 1, 4, 256>}, {pipeline_mode = #tpu.pipeline_mode<synchronous>, transform_indices = @transform_1, window_bounds = array<i64: 9, 256>}, {pipeline_mode = #tpu.pipeline_mode<synchronous>, transform_indices = @transform_2, window_bounds = array<i64: 16, 36>}, {pipeline_mode = #tpu.pipeline_mode<synchronous>, transform_indices = @transform_3, window_bounds = array<i64: 16, 1>}, {pipeline_mode = #tpu.pipeline_mode<synchronous>, transform_indices = @transform_4, window_bounds = array<i64: 16, 144>}, {pipeline_mode = #tpu.pipeline_mode<synchronous>, transform_indices = @transform_5, window_bounds = array<i64: 16, 1>}, {transform_indices = @transform_6, window_bounds = array<i64: 1, 8, 256>}]} {
    %c0 = arith.constant 0 : index
    %c0_0 = arith.constant 0 : index
    %0 = vector.load %arg2[%c0, %c0_0] : memref<9x256xf32, #tpu.memory_space<vmem>>, vector<9x256xf32>
    %c0_1 = arith.constant 0 : index
    %c0_2 = arith.constant 0 : index
    %c0_3 = arith.constant 0 : index
    %1 = vector.load %arg1[%c0_1, %c0_2, %c0_3] : memref<1x4x256xf32, #tpu.memory_space<vmem>>, vector<1x4x256xf32>
    %2 = vector.shape_cast %1 : vector<1x4x256xf32> to vector<4x256xf32>
    %c17_i32 = arith.constant 17 : i32
    %3 = tpu.dynamic_rotate %2 by %c17_i32 dim 1 : vector<4x256xf32>, i32 -> vector<4x256xf32>
    %4 = vector.extract_strided_slice %0 {offsets = [0, 0], sizes = [1, 256], strides = [1, 1]} : vector<9x256xf32> to vector<1x256xf32>
    %5 = vector.broadcast %4 : vector<1x256xf32> to vector<4x256xf32>
    %6 = arith.mulf %3, %5 : vector<4x256xf32>
    %c16_i32 = arith.constant 16 : i32
    %7 = tpu.dynamic_rotate %2 by %c16_i32 dim 1 : vector<4x256xf32>, i32 -> vector<4x256xf32>
    %8 = vector.extract_strided_slice %0 {offsets = [1, 0], sizes = [1, 256], strides = [1, 1]} : vector<9x256xf32> to vector<1x256xf32>
    %9 = vector.broadcast %8 : vector<1x256xf32> to vector<4x256xf32>
    %10 = arith.mulf %7, %9 : vector<4x256xf32>
    %c15_i32 = arith.constant 15 : i32
    %11 = tpu.dynamic_rotate %2 by %c15_i32 dim 1 : vector<4x256xf32>, i32 -> vector<4x256xf32>
    %12 = vector.extract_strided_slice %0 {offsets = [2, 0], sizes = [1, 256], strides = [1, 1]} : vector<9x256xf32> to vector<1x256xf32>
    %13 = vector.broadcast %12 : vector<1x256xf32> to vector<4x256xf32>
    %14 = arith.mulf %11, %13 : vector<4x256xf32>
    %c1_i32 = arith.constant 1 : i32
    %15 = tpu.dynamic_rotate %2 by %c1_i32 dim 1 : vector<4x256xf32>, i32 -> vector<4x256xf32>
    %16 = vector.extract_strided_slice %0 {offsets = [3, 0], sizes = [1, 256], strides = [1, 1]} : vector<9x256xf32> to vector<1x256xf32>
    %17 = vector.broadcast %16 : vector<1x256xf32> to vector<4x256xf32>
    %18 = arith.mulf %15, %17 : vector<4x256xf32>
    %c255_i32 = arith.constant 255 : i32
    %19 = tpu.dynamic_rotate %2 by %c255_i32 dim 1 : vector<4x256xf32>, i32 -> vector<4x256xf32>
    %20 = vector.extract_strided_slice %0 {offsets = [5, 0], sizes = [1, 256], strides = [1, 1]} : vector<9x256xf32> to vector<1x256xf32>
    %21 = vector.broadcast %20 : vector<1x256xf32> to vector<4x256xf32>
    %22 = arith.mulf %19, %21 : vector<4x256xf32>
    %c241_i32 = arith.constant 241 : i32
    %23 = tpu.dynamic_rotate %2 by %c241_i32 dim 1 : vector<4x256xf32>, i32 -> vector<4x256xf32>
    %24 = vector.extract_strided_slice %0 {offsets = [6, 0], sizes = [1, 256], strides = [1, 1]} : vector<9x256xf32> to vector<1x256xf32>
    %25 = vector.broadcast %24 : vector<1x256xf32> to vector<4x256xf32>
    %26 = arith.mulf %23, %25 : vector<4x256xf32>
    %c240_i32 = arith.constant 240 : i32
    %27 = tpu.dynamic_rotate %2 by %c240_i32 dim 1 : vector<4x256xf32>, i32 -> vector<4x256xf32>
    %28 = vector.extract_strided_slice %0 {offsets = [7, 0], sizes = [1, 256], strides = [1, 1]} : vector<9x256xf32> to vector<1x256xf32>
    %29 = vector.broadcast %28 : vector<1x256xf32> to vector<4x256xf32>
    %30 = arith.mulf %27, %29 : vector<4x256xf32>
    %c239_i32 = arith.constant 239 : i32
    %31 = tpu.dynamic_rotate %2 by %c239_i32 dim 1 : vector<4x256xf32>, i32 -> vector<4x256xf32>
    %32 = vector.extract_strided_slice %0 {offsets = [8, 0], sizes = [1, 256], strides = [1, 1]} : vector<9x256xf32> to vector<1x256xf32>
    %33 = vector.broadcast %32 : vector<1x256xf32> to vector<4x256xf32>
    %34 = arith.mulf %31, %33 : vector<4x256xf32>
    %35 = tpu.concatenate %6, %10, %14, %18, %2, %22, %26, %30, %34 in 0 : vector<4x256xf32>, vector<4x256xf32>, vector<4x256xf32>, vector<4x256xf32>, vector<4x256xf32>, vector<4x256xf32>, vector<4x256xf32>, vector<4x256xf32>, vector<4x256xf32> -> vector<36x256xf32>
    %c0_4 = arith.constant 0 : index
    %c0_5 = arith.constant 0 : index
    %36 = vector.load %arg3[%c0_4, %c0_5] : memref<16x36xf32, #tpu.memory_space<vmem>>, vector<16x36xf32>
    %cst = arith.constant dense<0.000000e+00> : vector<16x256xf32>
    %37 = tpu.matmul %36, %35, %cst {dimension_numbers = #tpu.dot_dimension_numbers<[1], [0], [0], [1], [0, 0, 1, 1], [], []>} : vector<16x36xf32>, vector<36x256xf32>, vector<16x256xf32> -> vector<16x256xf32>
    %c0_6 = arith.constant 0 : index
    %c0_7 = arith.constant 0 : index
    %38 = vector.load %arg4[%c0_6, %c0_7] : memref<16x1xf32, #tpu.memory_space<vmem>>, vector<16x1xf32>
    %39 = vector.broadcast %38 : vector<16x1xf32> to vector<16x256xf32>
    %40 = arith.addf %37, %39 : vector<16x256xf32>
    %cst_8 = arith.constant 0.000000e+00 : f32
    %41 = vector.broadcast %cst_8 : f32 to vector<16x256xf32>
    %42 = arith.maximumf %40, %41 : vector<16x256xf32>
    %c17_i32_9 = arith.constant 17 : i32
    %43 = tpu.dynamic_rotate %42 by %c17_i32_9 dim 1 : vector<16x256xf32>, i32 -> vector<16x256xf32>
    %44 = vector.extract_strided_slice %0 {offsets = [0, 0], sizes = [1, 256], strides = [1, 1]} : vector<9x256xf32> to vector<1x256xf32>
    %45 = vector.broadcast %44 : vector<1x256xf32> to vector<16x256xf32>
    %46 = arith.mulf %43, %45 : vector<16x256xf32>
    %c16_i32_10 = arith.constant 16 : i32
    %47 = tpu.dynamic_rotate %42 by %c16_i32_10 dim 1 : vector<16x256xf32>, i32 -> vector<16x256xf32>
    %48 = vector.extract_strided_slice %0 {offsets = [1, 0], sizes = [1, 256], strides = [1, 1]} : vector<9x256xf32> to vector<1x256xf32>
    %49 = vector.broadcast %48 : vector<1x256xf32> to vector<16x256xf32>
    %50 = arith.mulf %47, %49 : vector<16x256xf32>
    %c15_i32_11 = arith.constant 15 : i32
    %51 = tpu.dynamic_rotate %42 by %c15_i32_11 dim 1 : vector<16x256xf32>, i32 -> vector<16x256xf32>
    %52 = vector.extract_strided_slice %0 {offsets = [2, 0], sizes = [1, 256], strides = [1, 1]} : vector<9x256xf32> to vector<1x256xf32>
    %53 = vector.broadcast %52 : vector<1x256xf32> to vector<16x256xf32>
    %54 = arith.mulf %51, %53 : vector<16x256xf32>
    %c1_i32_12 = arith.constant 1 : i32
    %55 = tpu.dynamic_rotate %42 by %c1_i32_12 dim 1 : vector<16x256xf32>, i32 -> vector<16x256xf32>
    %56 = vector.extract_strided_slice %0 {offsets = [3, 0], sizes = [1, 256], strides = [1, 1]} : vector<9x256xf32> to vector<1x256xf32>
    %57 = vector.broadcast %56 : vector<1x256xf32> to vector<16x256xf32>
    %58 = arith.mulf %55, %57 : vector<16x256xf32>
    %c255_i32_13 = arith.constant 255 : i32
    %59 = tpu.dynamic_rotate %42 by %c255_i32_13 dim 1 : vector<16x256xf32>, i32 -> vector<16x256xf32>
    %60 = vector.extract_strided_slice %0 {offsets = [5, 0], sizes = [1, 256], strides = [1, 1]} : vector<9x256xf32> to vector<1x256xf32>
    %61 = vector.broadcast %60 : vector<1x256xf32> to vector<16x256xf32>
    %62 = arith.mulf %59, %61 : vector<16x256xf32>
    %c241_i32_14 = arith.constant 241 : i32
    %63 = tpu.dynamic_rotate %42 by %c241_i32_14 dim 1 : vector<16x256xf32>, i32 -> vector<16x256xf32>
    %64 = vector.extract_strided_slice %0 {offsets = [6, 0], sizes = [1, 256], strides = [1, 1]} : vector<9x256xf32> to vector<1x256xf32>
    %65 = vector.broadcast %64 : vector<1x256xf32> to vector<16x256xf32>
    %66 = arith.mulf %63, %65 : vector<16x256xf32>
    %c240_i32_15 = arith.constant 240 : i32
    %67 = tpu.dynamic_rotate %42 by %c240_i32_15 dim 1 : vector<16x256xf32>, i32 -> vector<16x256xf32>
    %68 = vector.extract_strided_slice %0 {offsets = [7, 0], sizes = [1, 256], strides = [1, 1]} : vector<9x256xf32> to vector<1x256xf32>
    %69 = vector.broadcast %68 : vector<1x256xf32> to vector<16x256xf32>
    %70 = arith.mulf %67, %69 : vector<16x256xf32>
    %c239_i32_16 = arith.constant 239 : i32
    %71 = tpu.dynamic_rotate %42 by %c239_i32_16 dim 1 : vector<16x256xf32>, i32 -> vector<16x256xf32>
    %72 = vector.extract_strided_slice %0 {offsets = [8, 0], sizes = [1, 256], strides = [1, 1]} : vector<9x256xf32> to vector<1x256xf32>
    %73 = vector.broadcast %72 : vector<1x256xf32> to vector<16x256xf32>
    %74 = arith.mulf %71, %73 : vector<16x256xf32>
    %75 = tpu.concatenate %46, %50, %54, %58, %42, %62, %66, %70, %74 in 0 : vector<16x256xf32>, vector<16x256xf32>, vector<16x256xf32>, vector<16x256xf32>, vector<16x256xf32>, vector<16x256xf32>, vector<16x256xf32>, vector<16x256xf32>, vector<16x256xf32> -> vector<144x256xf32>
    %c0_17 = arith.constant 0 : index
    %c0_18 = arith.constant 0 : index
    %76 = vector.load %arg5[%c0_17, %c0_18] : memref<16x144xf32, #tpu.memory_space<vmem>>, vector<16x144xf32>
    %cst_19 = arith.constant dense<0.000000e+00> : vector<16x256xf32>
    %77 = tpu.matmul %76, %75, %cst_19 {dimension_numbers = #tpu.dot_dimension_numbers<[1], [0], [0], [1], [0, 0, 1, 1], [], []>} : vector<16x144xf32>, vector<144x256xf32>, vector<16x256xf32> -> vector<16x256xf32>
    %c0_20 = arith.constant 0 : index
    %c0_21 = arith.constant 0 : index
    %78 = vector.load %arg6[%c0_20, %c0_21] : memref<16x1xf32, #tpu.memory_space<vmem>>, vector<16x1xf32>
    %79 = vector.broadcast %78 : vector<16x1xf32> to vector<16x256xf32>
    %80 = arith.addf %77, %79 : vector<16x256xf32>
    %cst_22 = arith.constant 0.000000e+00 : f32
    %81 = vector.broadcast %cst_22 : f32 to vector<16x256xf32>
    %82 = arith.maximumf %80, %81 : vector<16x256xf32>
    %83 = vector.extract_strided_slice %82 {offsets = [0, 0], sizes = [8, 256], strides = [1, 1]} : vector<16x256xf32> to vector<8x256xf32>
    %84 = vector.extract_strided_slice %82 {offsets = [8, 0], sizes = [8, 256], strides = [1, 1]} : vector<16x256xf32> to vector<8x256xf32>
    %85 = arith.negf %84 : vector<8x256xf32>
    %86 = math.exp %85 : vector<8x256xf32>
    %cst_23 = arith.constant 1.000000e+00 : f32
    %87 = vector.broadcast %cst_23 : f32 to vector<8x256xf32>
    %88 = arith.addf %87, %86 : vector<8x256xf32>
    %89 = arith.divf %87, %88 : vector<8x256xf32>
    %90 = arith.mulf %83, %89 : vector<8x256xf32>
    %cst_24 = arith.constant 0.000000e+00 : f32
    %91 = vector.broadcast %cst_24 : f32 to vector<8x256xf32>
    %92 = arith.cmpf oge, %90, %91 : vector<8x256xf32>
    %cst_25 = arith.constant 2.000000e-01 : f32
    %93 = vector.broadcast %cst_25 : f32 to vector<8x256xf32>
    %94 = arith.mulf %93, %90 : vector<8x256xf32>
    %95 = arith.select %92, %90, %94 : vector<8x256xi1>, vector<8x256xf32>
    %c0_26 = arith.constant 0 : index
    %c0_27 = arith.constant 0 : index
    %c0_28 = arith.constant 0 : index
    %96 = vector.load %arg7[%c0_26, %c0_27, %c0_28] : memref<1x8x256xf32, #tpu.memory_space<vmem>>, vector<1x8x256xf32>
    %97 = vector.shape_cast %96 : vector<1x8x256xf32> to vector<8x256xf32>
    %98 = vector.shape_cast %95 : vector<8x256xf32> to vector<1x8x256xf32>
    tpu.vector_store %arg7[%c0_26, %c0_27, %c0_28], %98 {strides = array<i32>} : memref<1x8x256xf32, #tpu.memory_space<vmem>>, vector<1x8x256xf32>,
    return
  }
  func.func @transform_0(%arg0: i32) -> (i32, i32, i32) {
    %c0_i32 = arith.constant 0 : i32
    %c0_i32_0 = arith.constant 0 : i32
    %c0_i32_1 = arith.constant 0 : i32
    return %arg0, %c0_i32, %c0_i32_0 : i32, i32, i32
  }
  func.func @transform_1(%arg0: i32) -> (i32, i32) {
    %c0_i32 = arith.constant 0 : i32
    %c0_i32_0 = arith.constant 0 : i32
    %c0_i32_1 = arith.constant 0 : i32
    return %c0_i32, %c0_i32_0 : i32, i32
  }
  func.func @transform_2(%arg0: i32) -> (i32, i32) {
    %c0_i32 = arith.constant 0 : i32
    %c0_i32_0 = arith.constant 0 : i32
    %c0_i32_1 = arith.constant 0 : i32
    return %c0_i32, %c0_i32_0 : i32, i32
  }
  func.func @transform_3(%arg0: i32) -> (i32, i32) {
    %c0_i32 = arith.constant 0 : i32
    %c0_i32_0 = arith.constant 0 : i32
    %c0_i32_1 = arith.constant 0 : i32
    return %c0_i32, %c0_i32_0 : i32, i32
  }
  func.func @transform_4(%arg0: i32) -> (i32, i32) {
    %c0_i32 = arith.constant 0 : i32
    %c0_i32_0 = arith.constant 0 : i32
    %c0_i32_1 = arith.constant 0 : i32
    return %c0_i32, %c0_i32_0 : i32, i32
  }
  func.func @transform_5(%arg0: i32) -> (i32, i32) {
    %c0_i32 = arith.constant 0 : i32
    %c0_i32_0 = arith.constant 0 : i32
    %c0_i32_1 = arith.constant 0 : i32
    return %c0_i32, %c0_i32_0 : i32, i32
  }
  func.func @transform_6(%arg0: i32) -> (i32, i32, i32) {
    %c0_i32 = arith.constant 0 : i32
    %c0_i32_0 = arith.constant 0 : i32
    %c0_i32_1 = arith.constant 0 : i32
    return %arg0, %c0_i32, %c0_i32_0 : i32, i32, i32
  }
}

</mosaic_0001>

<bundles_post_ra>
// kernel: tpu_custom_call.1
= control target key start
LH: loop header
LB: loop body
LE: loop exit
PB: predicated region body
PF: predicated region fallthrough
CT: control target
= control target key end

     0   :  { %s1822_s0 = inlined_call_operand.hbm [shape: f32[2,4,256], index: 0, kind: input, shape index: {}]   ;;  %s1823_s1 = inlined_call_operand.vmem [shape: f32[9,256], index: 1, kind: input, shape index: {}]   ;;  %s1824_s2 = inlined_call_operand.hbm [shape: f32[16,36], index: 2, kind: input, shape index: {}]   ;;  %s1825_s3 = inlined_call_operand.vmem [shape: f32[16,1], index: 3, kind: input, shape index: {}]   ;;  %s1826_s4 = inlined_call_operand.hbm [shape: f32[16,144], index: 4, kind: input, shape index: {}]   ;;  %s1827_s5 = inlined_call_operand.vmem [shape: f32[16,1], index: 5, kind: input, shape index: {}]   ;;  %s1828_s6 = inlined_call_operand.hbm [shape: f32[2,8,256], index: 6, kind: output, shape index: {}]  }
   0x1   :  { %1835 = sst [smem:[#allocation12_spill]] %s1824_s2 }
   0x2   :  { %11 = vsyncpa [#allocation3], 0 }
   0x3   :  { %13 = vsyncpa [#allocation3 + $0x1], 0 }
   0x4   :  { %14 = vsyncpa [#allocation6], 0 }
   0x5   :  { %15 = vsyncpa [#allocation4], 0 }
   0x6   :  { %17 = vsyncpa [#allocation4 + $0x1], 0  ;;  %s1267_s21 = smov 0   ;;  %s1269_s22 = smov 0  }
   0x7   :  { %s1271_s23 = smov 0   ;;  %s1273_s24 = smov 0  }
   0x8 LB: > { %s1288_s25 = sadd.s32 4294967295, %s1212_s24   ;;  %s942_s26 = sadd.s32 4294967294, %s1212_s24   ;;  %s1212_s24 = sphi %s1273_s24, %s1855_s24   ;;  %s1208_s23 = sphi %s1271_s23, %s1854_s23   ;;  %s1204_s22 = sphi %s1269_s22, %s1853_s22   ;;  %s1200_s21 = sphi %s1267_s21, %s1852_s21  }
   0x9   : > { %p43_p0 = scmp.ne.s32.totalorder %s1204_s22, %s1200_s21  ;;  %p1829_p1 = scmp.eq.s32.totalorder %s1288_s25, 0 }
   0xa   : > { %p178_p3 = scmp.eq.s32.totalorder %s942_s26, 1  ;;  %p943_p5 = scmp.ge.s32.totalorder %s1212_s24, 1 }
   0xb   : > { %p1297_p4 = por %p1829_p1, %p43_p0  ;;  %p185_p7 = scmp.lt.s32.totalorder %s1212_s24, 3 }
   0xc   : > { %p1302_p6 = por %p178_p3, %p43_p0  ;;  %s1214_s30 = smov [#allocation5]  }
   0xd   : > { %s1836_s27 = scalar_select %p1297_p4, 1, 0 }
   0xe   : > { %s1837_s28 = scalar_select %p1302_p6, 1, 0 }
   0xf   : > { %p1307_p8 = pnand %p943_p5, %p185_p7  ;;  %s200_s7 = sshll.u32 %s1214_s30, 4  ;;  %s201_s7 = int_to_ptr.vmem [resolvable:$true] %s200_s7 }
  0x10   : > { %s1215_s9 = smov [#allocation7]   ;;  %s1075_s11 = scalar_lea.vmem %s201_s7, 256 }
  0x11   : > { %s1838_s29 = scalar_select %p1307_p8, 1, 0 }
  0x12   : > { %p984_p9 = pneg %p1307_p8  ;;  %s216_s10 = sshll.u32 %s1215_s9, 4  ;;  %s217_s10 = int_to_ptr.vmem [resolvable:$true] %s216_s10 }
  0x13   : > { %p1076_p13 = scmp.ne.s32.totalorder %s201_s7, %s1075_s11  ;;  %p1083_p5 = scmp.lt.s32.totalorder %s201_s7, %s201_s7 }
  0x14   : > { %p1316_p11 = pnand %p984_p9, %p1829_p1  ;;  %p1084_p7 = scmp.lt.s32.totalorder %s1075_s11, %s1075_s11 }
  0x16   : > { %p1066_p12 = pneg %p1316_p11  ;;  %p1085_p10 = por %p1084_p7, %p1083_p5 }
  0x18   : > { %p1078_p0 = pnand %p1076_p13, %p1066_p12 }
  0x1a   : > { %p1079_p3 = pneg %p1078_p0 }
  0x1c   : > { %p1086_p9 = pnand %p1085_p10, %p1079_p3 }
  0x1e   : > { %1089 = shalt.err (!%p1086_p9)
}
  0x1f   : > { %s1216_s12 = smov 128   ;;  %s1217_s13 = smov 8  }
  0x20   : > { %s1840_s2 = sld [smem:[#allocation12_spill]]  ;;  %s1101_s16 = scalar_lea.vmem %s217_s10, 512 }
  0x21   : > { %p1102_p1 = scmp.ne.s32.totalorder %s217_s10, %s1101_s16  ;;  %p1109_p2 = scmp.lt.s32.totalorder %s217_s10, %s217_s10 }
  0x22   : > { %p1110_p6 = scmp.lt.s32.totalorder %s1101_s16, %s1101_s16 }
  0x23   : > { %p1104_p13 = pnand %p1102_p1, %p1066_p12 }
  0x24   : > { %p1111_p5 = por %p1110_p6, %p1109_p2 }
  0x25   : > { %p1105_p0 = pneg %p1104_p13 }
  0x26   : > { %987 = dma.hbm_to_vmem [thread:$0]  (!%p1316_p11), %s1840_s2, 256, %s201_s7, [#allocation6], %s1216_s12, %s1216_s12, %s1217_s13  }
  0x27   : > { %p1112_p10 = pnand %p1111_p5, %p1105_p0 }
  0x29   : > { %1115 = shalt.err (!%p1112_p10)
}
  0x2a   : > { %s1218_s17 = smov 256   ;;  %s1219_s18 = smov 16  }
  0x2b   : > { %990 = dma.hbm_to_vmem [thread:$0]  (!%p1316_p11), %s1826_s4, 512, %s217_s10, [#allocation6], %s1218_s17, %s1218_s17, %s1219_s18  }
  0x2c   : > { %s1339_s26 = sadd.s32 1, %s1212_s24   ;;  %s30_s7 = sadd.s32 1, %s1208_s23 }
  0x2d   : > { %s27_s30 = ssub.s32 %s1212_s24, %s1339_s26  ;;  %p37_p2 = scmp.ne.s32.totalorder %s1208_s23, %s1204_s22 }
  0x2e   : > { %p28_p1 = scmp.eq.s32.totalorder %s27_s30, 0  ;;  %p38_p6 = scmp.eq.s32.totalorder %s1212_s24, 0 }
  0x2f   : > { %p1841_p3 = scmp.eq.s32.totalorder %s1288_s25, 1  ;;  %p1001_p9 = scmp.lt.s32.totalorder %s1212_s24, 2 }
  0x30   : > { %s1348_s9 = scalar_select %p28_p1, %s1208_s23, %s30_s7  }
  0x31   : > { %p39_p12 = por %p38_p6, %p37_p2  ;;  %p1352_p7 = por %p1841_p3, %p37_p2 }
  0x32   : > { %s233_s8 = sand.u32 1, %s1208_s23   ;;  %s970_s10 = sshll.u32 %s1212_s24, 7 }
  0x33   : > { %s1842_s11 = scalar_select %p1352_p7, 1, 0 }
  0x34   : > { %s947_s12 = sshll.u32 %s233_s8, 3  ;;  %s1362_s15 = scalar_lea.hbm %s1822_s0, %s970_s10 }
  0x35   : > { %s237_s16 = scalar_lea.vmem [#allocation2], %s947_s12  ;;  %p1364_p11 = pnand %p1001_p9, %p39_p12 }
  0x36   : > { %s245_s17 = sshll.u32 %s237_s16, 4  ;;  %s234_s19 = scalar_lea.sflag [#allocation3], %s233_s8  ;;  %s246_s17 = int_to_ptr.vmem [resolvable:$true] %s245_s17 }
  0x37   : > { %s1116_s20 = scalar_lea.hbm %s1362_s15, 128  ;;  %p1118_p0 = pneg %p1364_p11 }
  0x38   : > { %p1117_p13 = scmp.ne.s32.totalorder %s1362_s15, %s1116_s20  ;;  %s1121_s10 = scalar_lea.hbm %s1822_s0, 256 }
  0x39   : > { %p1122_p1 = scmp.lt.s32.totalorder %s1362_s15, %s1822_s0  ;;  %p1123_p2 = scmp.lt.s32.totalorder %s1121_s10, %s1116_s20 }
  0x3a   : > { %p1119_p5 = pnand %p1118_p0, %p1117_p13 }
  0x3b   : > { %p1124_p6 = por %p1123_p2, %p1122_p1 }
  0x3c   : > { %p1120_p10 = pneg %p1119_p5 }
  0x3e   : > { %p1125_p12 = pnand %p1124_p6, %p1120_p10 }
  0x40   : > { %1128 = shalt.err (!%p1125_p12)
}
  0x41   : > { %s1129_s14 = scalar_lea.vmem %s246_s17, 128  ;;  %s1220_s8 = smov [#allocation2]  }
  0x42   : > { %p1130_p3 = scmp.ne.s32.totalorder %s246_s17, %s1129_s14  ;;  %s1134_s16 = sshll.u32 %s1220_s8, 4  ;;  %s1135_s16 = int_to_ptr.vmem [resolvable:$false] %s1134_s16 }
  0x43   : > { %s1136_s2 = scalar_lea.vmem %s1135_s16, 256  ;;  %p1137_p13 = scmp.lt.s32.totalorder %s246_s17, %s1135_s16 }
  0x44   : > { %p1132_p9 = pnand %p1130_p3, %p1118_p0  ;;  %p1138_p5 = scmp.lt.s32.totalorder %s1136_s2, %s1129_s14 }
  0x46   : > { %p1133_p7 = pneg %p1132_p9  ;;  %p1139_p4 = por %p1138_p5, %p1137_p13 }
  0x48   : > { %p1140_p8 = pnand %p1139_p4, %p1133_p7 }
  0x4a   : > { %1143 = shalt.err (!%p1140_p8)
}
  0x4b   : > { %994 = dma.hbm_to_vmem [thread:$0]  (!%p1364_p11), %s1362_s15, 128, %s246_s17, %s234_s19  }
  0x4c   : > { %p1844_p10 = scmp.ne.s32.totalorder %s1838_s29, 0 }
  0x4d   : > { %s1385_s20 = sand.u32 (!%p1844_p10), 1, %s1204_s22   ;;  %p1845_p0 = scmp.ne.s32.totalorder (!%p1844_p10), %s1836_s27, 0 }
  0x4e   : > { %254 = sbr.rel (%p1844_p10) target bundleno = 869 (0x365), region = 44  ;;  %s951_s30 = sshll.u32 (!%p1844_p10), %s1385_s20, 3 }
  0x4f   : > { %s257_s7 = scalar_lea.sflag (!%p1844_p10), [#allocation3], %s1385_s20  ;;  %s260_s10 = scalar_lea.vmem (!%p1844_p10), [#allocation2], %s951_s30 }
  0x53   : > { %1187 = dma.done.wait (%p1845_p0), %s257_s7, 128  }
  0x54   : > { %1189 = vsyncadd (%p1845_p0), %s257_s7, 4294967168  ;;  %p1846_p4 = scmp.eq.s32.totalorder %s1288_s25, 0 }
  0x56   : > { %1191 = dma.done.wait (%p1846_p4), [#allocation6], 768   ;;  %p1847_p8 = pmov %p1846_p4 }
  0x57   : > { %v1397_v0 = vld [vmem:[%s260_s10] sm:$0xff]  ;;  %s1833_s2 = smov 111   ;;  %s1222_s29 = smov 112   ;;  %v1227_v2 = vmov 0.0   ;;  %v1229_v3 = vmov 0   ;;  %v309_v6 = vlaneseq  ;;  %vm467_vm2 = vcmask 1043456  }
  0x58   : > { %1193 = vsyncadd (%p1847_p8), [#allocation6], 4294966528  ;;  %426 = vrot.lane.b32.xlu1 %v1397_v0, %s1833_s2  ;;  %409 = vrot.lane.b32.xlu0 %v1397_v0, %s1222_s29  ;;  %v1405_v1 = vcombine.high %v1397_v0, %v1397_v0  ;;  %s1223_s27 = smov 127   ;;  %s1224_s15 = smov 113   ;;  %v478_v4 = vld [vmem:[%s1825_s3] sm:$0xff]  ;;  %v479_v5 = vld [vmem:[%s1825_s3 + $0x8] sm:$0xff] }
  0x59   : > { %s1225_s17 = smov 1   ;;  %s1226_s18 = smov 16   ;;  %567 = vmatprep.mubr.f32.mxu0 %v1227_v2  ;;  %1054 = vset.pattern.permute.xlu1 %v1229_v3  ;;  %v1442_v7 = vshrl.u32 %v309_v6, 7  ;;  %v1444_v8 = vand.u32 127, %v309_v6  ;;  %v1452_v13 = vld [vmem:[%s1823_s1] sm:$0xff]  ;;  %v1462_v15 = vld [vmem:[%s1823_s1 + $0x8] sm:$0xff] }
  0x5a   : > { %s1228_s19 = smov 15   ;;  %1053 = vset.pattern.permute.xlu0 %v1229_v3  ;;  %s1230_s13 = smov 17   ;;  %v1457_v14 = vld [vmem:[%s1823_s1 + $0x10] ss:$0 sm:$0xff]  ;;  %v1467_v16 = vld [vmem:[%s1823_s1 + $0x18] ss:$0 sm:$0xff] }
  0x5b   : > { %v418_v11 = vsub.s32 7, %v1442_v7  ;;  %vm430_vm0 = vcmp.lt.s32.totalorder %v1444_v8, 111  ;;  %v384_v12 = vsub.s32 5, %v1442_v7  ;;  %vm379_vm1 = vcmp.lt.s32.totalorder %v1444_v8, 127  ;;  %s839_s14 = scalar_lea.sflag [#allocation4], %s1385_s20  ;;  %p1849_p11 = scmp.ne.s32.totalorder %s1842_s11, 0 }
  0x5c   : > { %375 = vrot.lane.b32.xlu0 %v1397_v0, %s1223_s27  ;;  %428 = vrot.lane.b32.xlu1 %v1405_v1, %s1833_s2  ;;  %v401_v19 = vsub.s32 6, %v1442_v7  ;;  %vm413_vm3 = vcmp.lt.s32.totalorder %v1444_v8, 112  ;;  %vm396_vm4 = vcmp.lt.s32.totalorder %v1444_v8, 113  ;;  %v367_v45 = vsub.s32 3, %v1442_v7  ;;  %s1848_s2 = smov 111  }
  0x5d   : > { %v1477_v22 = vrot.slane %v1452_v13, %v418_v11  ;;  %v1481_v24 = vrot.slane %v1462_v15, %v384_v12  ;;  %v1484_v25 = vrot.slane %v1462_v15, %v418_v11  ;;  %v1488_v27 = vrot.slane %v1452_v13, %v384_v12 }
  0x5e   : > { %v1493_v30 = vrot.slane %v1452_v13, %v401_v19  ;;  %v1508_v38 = vrot.slane %v1462_v15, %v401_v19  ;;  %vm362_vm5 = vcmp.lt.s32.totalorder %v1444_v8, 1  ;;  %v1522_v55 = vrot.slane %v1452_v13, %v367_v45 }
  0x5f   : > { %v1525_v56 = vrot.slane %v1462_v15, %v367_v45  ;;  %v333_v57 = vsub.s32 1, %v1442_v7  ;;  %v350_v61 = vsub.s32 2, %v1442_v7  ;;  %vm328_vm6 = vcmp.lt.s32.totalorder %v1444_v8, 16  ;;  %v477_v45 = vld [vmem:[#allocation5 + $0x8] sm:$0xff] }
  0x60   : > { %377 = vrot.lane.b32.xlu1 %v1405_v1, %s1223_s27  ;;  %411 = vrot.lane.b32.xlu0 %v1405_v1, %s1222_s29  ;;  %vm345_vm7 = vcmp.lt.s32.totalorder %v1444_v8, 15  ;;  %vm311_vm8 = vcmp.lt.s32.totalorder %v1444_v8, 17  ;;  %vm490_vm9 = vcmask 293888   ;;  %vm728_vm10 = vcmask 130048  }
  0x64   : > { %394 = vrot.lane.b32.xlu1 %v1405_v1, %s1224_s15  ;;  %392 = vrot.lane.b32.xlu0 %v1397_v0, %s1224_s15 }
  0x68   : > { %360 = vrot.lane.b32.xlu1 %v1405_v1, %s1225_s17  ;;  %358 = vrot.lane.b32.xlu0 %v1397_v0, %s1225_s17 }
  0x6c   : > { %326 = vrot.lane.b32.xlu1 %v1405_v1, %s1226_s18  ;;  %324 = vrot.lane.b32.xlu0 %v1397_v0, %s1226_s18 }
  0x70   : > { %343 = vrot.lane.b32.xlu1 %v1405_v1, %s1228_s19  ;;  %341 = vrot.lane.b32.xlu0 %v1397_v0, %s1228_s19 }
  0x74   : > { %307 = vrot.lane.b32.xlu1 %v1405_v1, %s1230_s13  ;;  %305 = vrot.lane.b32.xlu0 %v1397_v0, %s1230_s13 }
  0x78   : > { %482 = vperm.xlu1 %1054, %v478_v4   ;;  %487 = vperm.xlu0 %1053, %v479_v5   ;;  %v316_v4 = vsub.s32 0, %v1442_v7 }
  0x7a   : > { %v1563_v19 = vrot.slane %v1462_v15, %v316_v4 }
  0xca   : > { %v427_v9 = vpop.permute.xlu1 %426  ;;  %v410_v10 = vpop.permute.xlu0 %409 }
  0xce   : > { %v376_v17 = vpop.permute.xlu0 %375  ;;  %v429_v18 = vpop.permute.xlu1 %428 }
  0xcf   : > { %v431_v20 = vsel %vm430_vm0, %v427_v9, %v429_v18  ;;  %v432_v21 = vsel %vm430_vm0, %v429_v18, %v427_v9  ;;  %v1542_v9 = vrot.slane %v1452_v13, %v333_v57  ;;  %v1560_v18 = vrot.slane %v1452_v13, %v316_v4 }
  0xd0   : > { %v441_v23 = vmul.f32 %v1457_v14, %v431_v20  ;;  %v442_v26 = vmul.f32 %v1467_v16, %v432_v21 }
  0xd2   : > { %v378_v28 = vpop.permute.xlu1 %377  ;;  %v412_v29 = vpop.permute.xlu0 %411  ;;  %957 = vmatprep.subr.msk.mxu0 %vm467_vm2, %v442_v26 }
  0xd3   : > { %v380_v31 = vsel %vm379_vm1, %v376_v17, %v378_v28  ;;  %v381_v32 = vsel %vm379_vm1, %v378_v28, %v376_v17  ;;  %v414_v33 = vsel %vm413_vm3, %v410_v10, %v412_v29  ;;  %v415_v34 = vsel %vm413_vm3, %v412_v29, %v410_v10  ;;  %958 = vmatpush1.msk.msra.mxu0 %vm467_vm2, %v441_v23 }
  0xd4   : > { %v391_v35 = vmul.f32 %v1481_v24, %v381_v32  ;;  %v424_v36 = vmul.f32 %v1477_v22, %v414_v33  ;;  %v425_v37 = vmul.f32 %v1484_v25, %v415_v34  ;;  %v390_v39 = vmul.f32 %v1488_v27, %v380_v31 }
  0xd5   : > { %v1552_v10 = vrot.slane %v1462_v15, %v350_v61 }
  0xd6   : > { %v395_v40 = vpop.permute.xlu1 %394  ;;  %v393_v41 = vpop.permute.xlu0 %392  ;;  %v458_v42 = vrot.slane %v391_v35, 4  ;;  %v463_v46 = vrot.slane %v424_v36, 4  ;;  %v464_v47 = vrot.slane %v425_v37, 4  ;;  %v457_v50 = vrot.slane %v390_v39, 4 }
  0xd7   : > { %v397_v43 = vsel %vm396_vm4, %v393_v41, %v395_v40  ;;  %v398_v44 = vsel %vm396_vm4, %v395_v40, %v393_v41 }
  0xd8   : > { %v407_v48 = vmul.f32 %v1493_v30, %v397_v43  ;;  %v408_v49 = vmul.f32 %v1508_v38, %v398_v44  ;;  %v473_v60 = vsel %vm467_vm2, %v1405_v1, %v458_v42  ;;  %v472_v62 = vsel %vm467_vm2, %v1397_v0, %v457_v50  ;;  %v476_v44 = vld [vmem:[#allocation5] sm:$0xff] }
  0xd9   : > { %v1545_v1 = vrot.slane %v1462_v15, %v333_v57  ;;  %v1549_v0 = vrot.slane %v1452_v13, %v350_v61  ;;  %v713_v61 = vld [vmem:[#allocation7 + $0x8] sm:$0xff] }
  0xda   : > { %v361_v51 = vpop.permute.xlu1 %360  ;;  %v359_v52 = vpop.permute.xlu0 %358  ;;  %v475_v53 = vsel %vm467_vm2, %v408_v49, %v464_v47  ;;  %v474_v54 = vsel %vm467_vm2, %v407_v48, %v463_v46  ;;  %961 = vmatprep.mubr.msk.f32.mxu1 %vm728_vm10, %v713_v61 }
  0xdb   : > { %527 = vmatprep.subr.mxu0 %v475_v53  ;;  %v363_v58 = vsel %vm362_vm5, %v359_v52, %v361_v51  ;;  %v364_v59 = vsel %vm362_vm5, %v361_v51, %v359_v52 }
  0xdc   : > { %528 = vmatpush1.msra.mxu0 %v474_v54  ;;  %v373_v5 = vmul.f32 %v1522_v55, %v364_v59  ;;  %v374_v6 = vmul.f32 %v1525_v56, %v363_v58 }
  0xdd   : > { %529 = vmatprep.subr.mxu0 %v473_v60 }
  0xde   : > { %v327_v63 = vpop.permute.xlu1 %326  ;;  %v325_v3 = vpop.permute.xlu0 %324  ;;  %530 = vmatpush1.msra.mxu0 %v472_v62  ;;  %v451_v20 = vrot.slane %v373_v5, 4  ;;  %v452_v21 = vrot.slane %v374_v6, 4  ;;  %v717_v62 = vld [vmem:[%s1827_s5 + $0x8] sm:$0xff] }
  0xdf   : > { %v329_v7 = vsel %vm328_vm6, %v325_v3, %v327_v63  ;;  %v330_v11 = vsel %vm328_vm6, %v327_v63, %v325_v3  ;;  %v716_v63 = vld [vmem:[%s1827_s5] sm:$0xff] }
  0xe0   : > { %v339_v28 = vmul.f32 %v1542_v9, %v330_v11  ;;  %v340_v29 = vmul.f32 %v1545_v1, %v329_v7 }
  0xe2   : > { %v344_v12 = vpop.permute.xlu1 %343  ;;  %v342_v17 = vpop.permute.xlu0 %341  ;;  %v445_v37 = vrot.slane %v339_v28, 4  ;;  %v446_v39 = vrot.slane %v340_v29, 4 }
  0xe3   : > { %v346_v23 = vsel %vm345_vm7, %v342_v17, %v344_v12  ;;  %v347_v26 = vsel %vm345_vm7, %v344_v12, %v342_v17 }
  0xe4   : > { %v356_v31 = vmul.f32 %v1549_v0, %v347_v26  ;;  %v357_v13 = vmul.f32 %v1552_v10, %v346_v23 }
  0xe6   : > { %v308_v32 = vpop.permute.xlu1 %307  ;;  %v306_v33 = vpop.permute.xlu0 %305  ;;  %v471_v15 = vsel %vm467_vm2, %v357_v13, %v452_v21  ;;  %v470_v34 = vsel %vm467_vm2, %v356_v31, %v451_v20 }
  0xe7   : > { %v312_v35 = vsel %vm311_vm8, %v306_v33, %v308_v32  ;;  %v313_v36 = vsel %vm311_vm8, %v308_v32, %v306_v33  ;;  %531 = vmatprep.subr.mxu0 %v471_v15 }
  0xe8   : > { %v322_v40 = vmul.f32 %v1560_v18, %v313_v36  ;;  %v323_v41 = vmul.f32 %v1563_v19, %v312_v35  ;;  %532 = vmatpush1.msra.mxu0 %v470_v34 }
  0xea   : > { %v469_v42 = vsel %vm467_vm2, %v323_v41, %v446_v39  ;;  %v468_v43 = vsel %vm467_vm2, %v322_v40, %v445_v37 }
  0xeb   : > { %533 = vmatprep.subr.mxu0 %v469_v42 }
  0xec   : > { %534 = vmatpush1.msra.mxu0 %v468_v43 }
  0xed   : > { %959 = vmatmul.mubr.msk.f32.vlgmr.msra.gmra.mxu0 %vm490_vm9, %v476_v44 }
  0xee   : > { %573 = vmatprep.mubr.f32.mxu0 %v1227_v2 }
  0xf1   : > { %960 = vmatmul.mubr.msk.f32.gmra.mxu0 %vm490_vm9, %v477_v45 }
  0xf3   : > { %v483_v46 = vpop.permute.xlu1 %482  ;;  %v488_v53 = vpop.permute.xlu0 %487 }
 0x1ad   : > { %v569_v47 = vpop.f32.mrf.mxu0 }
 0x1ae   : > { %v570_v48 = vadd.f32 %v569_v47, %v483_v46 }
 0x1af   : > { %v571_v49 = vpop.f32.mrf.mxu0 }
 0x1b0   : > { %v1584_v50 = vmax.f32 %v570_v48, 0.0  ;;  %v572_v51 = vadd.f32 %v571_v49, %v483_v46 }
 0x1b1   : > { %v575_v2 = vpop.f32.mrf.mxu0 }
 0x1b2   : > { %v1586_v52 = vmax.f32 %v572_v51, 0.0  ;;  %680 = vrot.lane.b32.xlu1 %v1584_v50, %s1222_s29  ;;  %v576_v54 = vadd.f32 %v575_v2, %v488_v53 }
 0x1b3   : > { %v577_v57 = vpop.f32.mrf.mxu0 }
 0x1b4   : > { %684 = vrot.lane.b32.xlu0 %v1586_v52, %s1222_s29  ;;  %v1608_v58 = vmax.f32 %v576_v54, 0.0  ;;  %v578_v59 = vadd.f32 %v577_v57, %v488_v53 }
 0x1b6   : > { %664 = vrot.lane.b32.xlu1 %v1584_v50, %s1224_s15  ;;  %v1614_v60 = vmax.f32 %v578_v59, 0.0 }
 0x1b8   : > { %668 = vrot.lane.b32.xlu0 %v1586_v52, %s1224_s15 }
 0x1ba   : > { %648 = vrot.lane.b32.xlu1 %v1584_v50, %s1223_s27 }
 0x1bc   : > { %652 = vrot.lane.b32.xlu0 %v1586_v52, %s1223_s27 }
 0x1be   : > { %632 = vrot.lane.b32.xlu1 %v1584_v50, %s1225_s17 }
 0x1c0   : > { %636 = vrot.lane.b32.xlu0 %v1586_v52, %s1225_s17 }
 0x1c2   : > { %616 = vrot.lane.b32.xlu1 %v1584_v50, %s1228_s19 }
 0x1c4   : > { %620 = vrot.lane.b32.xlu0 %v1586_v52, %s1228_s19 }
 0x1c6   : > { %600 = vrot.lane.b32.xlu1 %v1584_v50, %s1226_s18 }
 0x1c8   : > { %604 = vrot.lane.b32.xlu0 %v1586_v52, %s1226_s18 }
 0x1ca   : > { %682 = vrot.lane.b32.xlu1 %v1608_v58, %s1222_s29 }
 0x1cc   : > { %686 = vrot.lane.b32.xlu0 %v1614_v60, %s1222_s29 }
 0x1ce   : > { %666 = vrot.lane.b32.xlu1 %v1608_v58, %s1224_s15 }
 0x1d0   : > { %670 = vrot.lane.b32.xlu0 %v1614_v60, %s1224_s15 }
 0x1d2   : > { %650 = vrot.lane.b32.xlu1 %v1608_v58, %s1223_s27 }
 0x1d4   : > { %654 = vrot.lane.b32.xlu0 %v1614_v60, %s1223_s27 }
 0x1d6   : > { %584 = vrot.lane.b32.xlu1 %v1584_v50, %s1230_s13 }
 0x1d8   : > { %588 = vrot.lane.b32.xlu0 %v1586_v52, %s1230_s13 }
 0x1da   : > { %634 = vrot.lane.b32.xlu1 %v1608_v58, %s1225_s17 }
 0x1dc   : > { %638 = vrot.lane.b32.xlu0 %v1614_v60, %s1225_s17 }
 0x1de   : > { %618 = vrot.lane.b32.xlu1 %v1608_v58, %s1228_s19 }
 0x1e0   : > { %622 = vrot.lane.b32.xlu0 %v1614_v60, %s1228_s19  ;;  %s971_s19 = sshll.u32 %s1288_s25, 8  ;;  %s1231_s25 = smov [#allocation8]  }
 0x1e1   : > { %s1785_s12 = scalar_lea.hbm %s1828_s6, %s971_s19  ;;  %s1148_s16 = sshll.u32 %s1231_s25, 4  ;;  %s1149_s16 = int_to_ptr.vmem [resolvable:$false] %s1148_s16 }
 0x1e2   : > { %602 = vrot.lane.b32.xlu1 %v1608_v58, %s1226_s18 }
 0x1e4   : > { %606 = vrot.lane.b32.xlu0 %v1614_v60, %s1226_s18  ;;  %s954_s18 = sshll.u32 %s1385_s20, 4 }
 0x1e6   : > { %586 = vrot.lane.b32.xlu1 %v1608_v58, %s1230_s13 }
 0x1e8   : > { %590 = vrot.lane.b32.xlu0 %v1614_v60, %s1230_s13  ;;  %s296_s13 = scalar_lea.vmem [#allocation8], %s954_s18 }
 0x1e9   : > { %s853_s30 = sshll.u32 %s296_s13, 4  ;;  %s854_s30 = int_to_ptr.vmem [resolvable:$true] %s853_s30 }
 0x1ea   : > { %698 = vrot.lane.b32.xlu1 %v1608_v58, %s1848_s2  ;;  %s1144_s8 = scalar_lea.vmem %s854_s30, 256  ;;  %p1151_p6 = scmp.lt.s32.totalorder %s854_s30, %s1149_s16 }
 0x1eb   : > { %p1145_p7 = scmp.ne.s32.totalorder %s854_s30, %s1144_s8 }
 0x1ec   : > { %702 = vrot.lane.b32.xlu0 %v1614_v60, %s1848_s2 }
 0x1ed   : > { %p1146_p1 = pnand %p1145_p7, %p1849_p11 }
 0x1ee   : > { %696 = vrot.lane.b32.xlu1 %v1584_v50, %s1848_s2 }
 0x1ef   : > { %p1147_p2 = pneg %p1146_p1 }
 0x1f0   : > { %700 = vrot.lane.b32.xlu0 %v1586_v52, %s1848_s2  ;;  %s1150_s2 = scalar_lea.vmem %s1149_s16, 512 }
 0x1f1   : > { %p1152_p12 = scmp.lt.s32.totalorder %s1150_s2, %s1144_s8 }
 0x1f2   : > { %725 = vperm.xlu1 %1054, %v717_v62  }
 0x1f3   : > { %p1153_p3 = por %p1152_p12, %p1151_p6 }
 0x1f4   : > { %720 = vperm.xlu0 %1053, %v716_v63  }
 0x1f5   : > { %p1154_p9 = pnand %p1153_p3, %p1147_p2 }
 0x224   : > { %v681_v3 = vpop.permute.xlu1 %680 }
 0x226   : > { %v685_v4 = vpop.permute.xlu0 %684 }
 0x227   : > { %v690_v31 = vsel %vm413_vm3, %v685_v4, %v681_v3  ;;  %v688_v33 = vsel %vm413_vm3, %v681_v3, %v685_v4 }
 0x228   : > { %v665_v5 = vpop.permute.xlu1 %664  ;;  %v693_v36 = vmul.f32 %v690_v31, %v1484_v25  ;;  %v692_v39 = vmul.f32 %v688_v33, %v1477_v22 }
 0x22a   : > { %v669_v6 = vpop.permute.xlu0 %668 }
 0x22b   : > { %v674_v40 = vsel %vm396_vm4, %v669_v6, %v665_v5  ;;  %v672_v43 = vsel %vm396_vm4, %v665_v5, %v669_v6 }
 0x22c   : > { %v649_v7 = vpop.permute.xlu1 %648  ;;  %v676_v47 = vmul.f32 %v672_v43, %v1493_v30 }
 0x22e   : > { %v653_v11 = vpop.permute.xlu0 %652 }
 0x22f   : > { %v658_v48 = vsel %vm379_vm1, %v653_v11, %v649_v7  ;;  %v656_v2 = vsel %vm379_vm1, %v649_v7, %v653_v11 }
 0x230   : > { %v633_v12 = vpop.permute.xlu1 %632  ;;  %v660_v59 = vmul.f32 %v656_v2, %v1488_v27  ;;  %v714_v2 = vld [vmem:[#allocation7 + $0x10] sm:$0xff] }
 0x232   : > { %v637_v17 = vpop.permute.xlu0 %636 }
 0x233   : > { %v640_v63 = vsel %vm362_vm5, %v633_v12, %v637_v17 }
 0x234   : > { %v1663_v20 = vpop.permute.xlu1 %616  ;;  %v645_v6 = vmul.f32 %v640_v63, %v1525_v56 }
 0x236   : > { %v1665_v21 = vpop.permute.xlu0 %620 }
 0x238   : > { %v1667_v23 = vpop.permute.xlu1 %600 }
 0x23a   : > { %v1669_v26 = vpop.permute.xlu0 %604 }
 0x23c   : > { %v683_v28 = vpop.permute.xlu1 %682 }
 0x23e   : > { %v687_v29 = vpop.permute.xlu0 %686 }
 0x23f   : > { %v689_v13 = vsel %vm413_vm3, %v683_v28, %v687_v29  ;;  %v691_v32 = vsel %vm413_vm3, %v687_v29, %v683_v28 }
 0x240   : > { %v667_v15 = vpop.permute.xlu1 %666  ;;  %v695_v34 = vmul.f32 %v691_v32, %v1484_v25  ;;  %v694_v35 = vmul.f32 %v689_v13, %v1477_v22  ;;  %v677_v22 = vmul.f32 %v674_v40, %v1508_v38  ;;  %v608_v13 = vsel %vm328_vm6, %v1667_v23, %v1669_v26 }
 0x242   : > { %v671_v37 = vpop.permute.xlu0 %670  ;;  %735 = vmatprep.subr.mxu1 %v695_v34 }
 0x243   : > { %v673_v41 = vsel %vm396_vm4, %v667_v15, %v671_v37  ;;  %v675_v42 = vsel %vm396_vm4, %v671_v37, %v667_v15  ;;  %736 = vmatpush1.msra.mxu1 %v694_v35  ;;  %v613_v15 = vmul.f32 %v608_v13, %v1545_v1 }
 0x244   : > { %v678_v44 = vmul.f32 %v673_v41, %v1493_v30  ;;  %v679_v25 = vmul.f32 %v675_v42, %v1508_v38  ;;  %737 = vmatprep.subr.mxu1 %v693_v36  ;;  %v651_v45 = vpop.permute.xlu1 %650  ;;  %v661_v30 = vmul.f32 %v658_v48, %v1481_v24 }
 0x245   : > { %738 = vmatpush1.msra.mxu1 %v692_v39 }
 0x246   : > { %v655_v46 = vpop.permute.xlu0 %654  ;;  %739 = vmatprep.subr.mxu1 %v679_v25 }
 0x247   : > { %v657_v49 = vsel %vm379_vm1, %v651_v45, %v655_v46  ;;  %v659_v51 = vsel %vm379_vm1, %v655_v46, %v651_v45  ;;  %740 = vmatpush1.msra.mxu1 %v678_v44 }
 0x248   : > { %v662_v53 = vmul.f32 %v657_v49, %v1488_v27  ;;  %v663_v38 = vmul.f32 %v659_v51, %v1481_v24  ;;  %741 = vmatprep.subr.mxu1 %v677_v22  ;;  %v585_v54 = vpop.permute.xlu1 %584  ;;  %v642_v27 = vsel %vm362_vm5, %v637_v17, %v633_v12  ;;  %v712_v49 = vld [vmem:[#allocation7] sm:$0xff]  ;;  %v715_v51 = vld [vmem:[#allocation7 + $0x18] sm:$0xff] }
 0x249   : > { %742 = vmatpush1.msra.mxu1 %v676_v47  ;;  %v644_v11 = vmul.f32 %v642_v27, %v1522_v55 }
 0x24a   : > { %v589_v57 = vpop.permute.xlu0 %588  ;;  %743 = vmatprep.subr.mxu1 %v663_v38 }
 0x24b   : > { %744 = vmatpush1.msra.mxu1 %v662_v53  ;;  %v592_v36 = vsel %vm311_vm8, %v585_v54, %v589_v57 }
 0x24c   : > { %745 = vmatprep.subr.mxu1 %v661_v30  ;;  %v635_v61 = vpop.permute.xlu1 %634 }
 0x24d   : > { %746 = vmatpush1.msra.mxu1 %v660_v59 }
 0x24e   : > { %v639_v62 = vpop.permute.xlu0 %638  ;;  %747 = vmatprep.subr.mxu1 %v1614_v60 }
 0x24f   : > { %v641_v3 = vsel %vm362_vm5, %v635_v61, %v639_v62  ;;  %v643_v24 = vsel %vm362_vm5, %v639_v62, %v635_v61  ;;  %748 = vmatpush1.msra.mxu1 %v1608_v58  ;;  %v624_v58 = vsel %vm345_vm7, %v1663_v20, %v1665_v21 }
 0x250   : > { %v646_v4 = vmul.f32 %v643_v24, %v1522_v55  ;;  %v647_v5 = vmul.f32 %v641_v3, %v1525_v56  ;;  %749 = vmatprep.subr.mxu1 %v1586_v52  ;;  %v619_v60 = vpop.permute.xlu1 %618  ;;  %v626_v56 = vsel %vm345_vm7, %v1665_v21, %v1663_v20  ;;  %v629_v28 = vmul.f32 %v624_v58, %v1552_v10 }
 0x251   : > { %750 = vmatpush1.msra.mxu1 %v1584_v50  ;;  %v628_v31 = vmul.f32 %v626_v56, %v1549_v0 }
 0x252   : > { %v623_v7 = vpop.permute.xlu0 %622  ;;  %751 = vmatprep.subr.mxu1 %v647_v5 }
 0x253   : > { %v625_v12 = vsel %vm345_vm7, %v619_v60, %v623_v7  ;;  %v627_v52 = vsel %vm345_vm7, %v623_v7, %v619_v60  ;;  %752 = vmatpush1.msra.mxu1 %v646_v4 }
 0x254   : > { %v630_v50 = vmul.f32 %v627_v52, %v1549_v0  ;;  %v631_v55 = vmul.f32 %v625_v12, %v1552_v10  ;;  %753 = vmatprep.subr.mxu1 %v645_v6  ;;  %v603_v17 = vpop.permute.xlu1 %602  ;;  %v610_v10 = vsel %vm328_vm6, %v1669_v26, %v1667_v23  ;;  %v594_v26 = vsel %vm311_vm8, %v589_v57, %v585_v54 }
 0x255   : > { %754 = vmatpush1.msra.mxu1 %v644_v11  ;;  %v612_v35 = vmul.f32 %v610_v10, %v1542_v9  ;;  %v596_v42 = vmul.f32 %v594_v26, %v1560_v18 }
 0x256   : > { %v607_v29 = vpop.permute.xlu0 %606  ;;  %755 = vmatprep.subr.mxu1 %v631_v55 }
 0x257   : > { %v609_v20 = vsel %vm328_vm6, %v603_v17, %v607_v29  ;;  %v611_v21 = vsel %vm328_vm6, %v607_v29, %v603_v17  ;;  %756 = vmatpush1.msra.mxu1 %v630_v50 }
 0x258   : > { %v614_v32 = vmul.f32 %v611_v21, %v1542_v9  ;;  %v615_v0 = vmul.f32 %v609_v20, %v1545_v1  ;;  %757 = vmatprep.subr.mxu1 %v629_v28  ;;  %v587_v33 = vpop.permute.xlu1 %586  ;;  %v597_v9 = vmul.f32 %v592_v36, %v1563_v19 }
 0x259   : > { %758 = vmatpush1.msra.mxu1 %v628_v31 }
 0x25a   : > { %v591_v34 = vpop.permute.xlu0 %590  ;;  %759 = vmatprep.subr.mxu1 %v615_v0 }
 0x25b   : > { %v593_v37 = vsel %vm311_vm8, %v587_v33, %v591_v34  ;;  %v595_v23 = vsel %vm311_vm8, %v591_v34, %v587_v33  ;;  %760 = vmatpush1.msra.mxu1 %v614_v32 }
 0x25c   : > { %v598_v39 = vmul.f32 %v595_v23, %v1560_v18  ;;  %v599_v1 = vmul.f32 %v593_v37, %v1563_v19  ;;  %761 = vmatprep.subr.mxu1 %v613_v15  ;;  %v699_v40 = vpop.permute.xlu1 %698 }
 0x25d   : > { %762 = vmatpush1.msra.mxu1 %v612_v35 }
 0x25e   : > { %v703_v41 = vpop.permute.xlu0 %702  ;;  %763 = vmatprep.subr.mxu1 %v599_v1 }
 0x25f   : > { %v705_v43 = vsel %vm430_vm0, %v699_v40, %v703_v41  ;;  %v707_v44 = vsel %vm430_vm0, %v703_v41, %v699_v40  ;;  %764 = vmatpush1.msra.mxu1 %v598_v39 }
 0x260   : > { %v710_v25 = vmul.f32 %v1457_v14, %v705_v43  ;;  %v711_v45 = vmul.f32 %v1467_v16, %v707_v44  ;;  %765 = vmatprep.subr.mxu1 %v597_v9  ;;  %v697_v22 = vpop.permute.xlu1 %696 }
 0x261   : > { %766 = vmatpush1.msra.mxu1 %v596_v42 }
 0x262   : > { %v701_v46 = vpop.permute.xlu0 %700  ;;  %795 = vmatprep.subr.mxu1 %v711_v45 }
 0x263   : > { %v704_v19 = vsel %vm430_vm0, %v697_v22, %v701_v46  ;;  %v706_v18 = vsel %vm430_vm0, %v701_v46, %v697_v22  ;;  %796 = vmatpush2.msra.mxu1 %v710_v25 }
 0x264   : > { %v708_v47 = vmul.f32 %v1457_v14, %v704_v19  ;;  %v709_v48 = vmul.f32 %v1467_v16, %v706_v18 }
 0x266   : > { %797 = vmatprep.subr.mxu1 %v709_v48 }
 0x267   : > { %798 = vmatpush2.msra.mxu1 %v708_v47 }
 0x268   : > { %800 = vmatmul.mubr.f32.vlgmr.msra.gmra.mxu1 %v712_v49 }
 0x269   : > { %962 = vmatprep.mubr.msk.f32.mxu1 %vm728_vm10, %v715_v51 }
 0x26c   : > { %806 = vmatmul.mubr.f32.gmra.mxu1 %v714_v2 }
 0x26d   : > { %v726_v54 = vpop.permute.xlu1 %725 }
 0x26f   : > { %v721_v4 = vpop.permute.xlu0 %720 }
 0x328   : > { %v801_v53 = vpop.f32.mrf.mxu1 }
 0x329   : > { %v802_v5 = vadd.f32 %v801_v53, %v721_v4 }
 0x32a   : > { %v803_v38 = vpop.f32.mrf.mxu1 }
 0x32b   : > { %v804_v60 = vadd.f32 %v803_v38, %v721_v4  ;;  %v812_v6 = vmax.f32 %v802_v5, 0.0 }
 0x32c   : > { %v807_v30 = vpop.f32.mrf.mxu1 }
 0x32d   : > { %v808_v8 = vadd.f32 %v807_v30, %v726_v54  ;;  %v813_v11 = vmax.f32 %v804_v60, 0.0 }
 0x32e   : > { %v809_v57 = vpop.f32.mrf.mxu1 }
 0x32f   : > { %v814_v59 = vmax.f32 %v808_v8, 0.0  ;;  %v810_v14 = vadd.f32 %v809_v57, %v726_v54 }
 0x331   : > { %v963_v61 = vmul.f32 -1.442695, %v814_v59  ;;  %v815_v16 = vmax.f32 %v810_v14, 0.0 }
 0x333   : > { %1056 = vpow2.f32 %v963_v61  ;;  %v964_v62 = vmul.f32 -1.442695, %v815_v16 }
 0x335   : > { %1058 = vpow2.f32 %v964_v62 }
 0x340   : > { %v1057_v63 = vpop.eup %1056 }
 0x341   : > { %v822_v3 = vadd.f32 1.0, %v1057_v63 }
 0x342   : > { %v1059_v24 = vpop.eup %1058 }
 0x343   : > { %1060 = vrcp.f32 %v822_v3  ;;  %v823_v27 = vadd.f32 1.0, %v1059_v24 }
 0x345   : > { %1062 = vrcp.f32 %v823_v27 }
 0x350   : > { %v1061_v7 = vpop.eup %1060 }
 0x351   : > { %v828_v58 = vmul.f32 %v1061_v7, %v812_v6 }
 0x352   : > { %v1063_v12 = vpop.eup %1062 }
 0x353   : > { %v829_v52 = vmul.f32 %v1063_v12, %v813_v11  ;;  %vm830_vm11 = vcmp.ge.f32.partialorder %v828_v58, 0.0  ;;  %v832_v56 = vmul.f32 0.2, %v828_v58 }
 0x355   : > { %vm831_vm12 = vcmp.ge.f32.partialorder %v829_v52, 0.0  ;;  %v833_v50 = vmul.f32 0.2, %v829_v52  ;;  %v834_v55 = vsel %vm830_vm11, %v828_v58, %v832_v56 }
 0x356   : > { %836 = vst [vmem:[%s296_s13] sm:$0xff] %v834_v55 }
 0x357   : > { %v835_v17 = vsel %vm831_vm12, %v829_v52, %v833_v50 }
 0x358   : > { %837 = vst [vmem:[%s296_s13 + $0x8] sm:$0xff] %v835_v17 }
 0x359   : > { %1157 = shalt.err (!%p1154_p9)
}
 0x35a   : > { %s1158_s29 = scalar_lea.hbm %s1785_s12, 256  ;;  %s1162_s15 = scalar_lea.hbm %s1828_s6, 512 }
 0x35b   : > { %p1159_p13 = scmp.ne.s32.totalorder %s1785_s12, %s1158_s29  ;;  %p1163_p0 = scmp.lt.s32.totalorder %s1785_s12, %s1828_s6 }
 0x35c   : > { %p1164_p4 = scmp.lt.s32.totalorder %s1162_s15, %s1158_s29 }
 0x35d   : > { %p1160_p5 = pnand %p1159_p13, %p1849_p11 }
 0x35e   : > { %p1165_p8 = por %p1164_p4, %p1163_p0 }
 0x35f   : > { %p1161_p10 = pneg %p1160_p5 }
 0x361   : > { %p1166_p7 = pnand %p1165_p8, %p1161_p10 }
 0x363   : > { %1169 = shalt.err (!%p1166_p7)
}
 0x364   : > { %982 = dma.vmem_to_hbm [thread:$0]  (%p1849_p11), %s854_s30, 256, %s1785_s12, %s839_s14  }
 0x365 PF: > { %s865_s19 = sand.u32 1, %s1200_s21   ;;  %p1850_p1 = scmp.ne.s32.totalorder %s1837_s28, 0 }
 0x366   : > { %p1851_p2 = scmp.ge.s32.totalorder %s1212_s24, 2  ;;  %s866_s13 = scalar_lea.sflag [#allocation4], %s865_s19 }
 0x368   : > { %p996_p6 = pnand %p1851_p2, %p1850_p1 }
 0x36a   : > { %p997_p12 = pneg %p996_p6 }
 0x36c   : > { %1195 = dma.done.wait (%p997_p12), %s866_s13, 256  }
 0x36d   : > { %1197 = vsyncadd (%p997_p12), %s866_s13, 4294967040  ;;  %p20_p3 = scmp.ge.s32.totalorder %s1339_s26, 4   ;;  %s1852_s21 = smov %s1204_s22 }
 0x36e   : > { %s1853_s22 = smov %s1208_s23  ;;  %s1854_s23 = smov %s1348_s9 }
 0x36f   : > { %s1855_s24 = smov %s1339_s26  ;;  %22 = sbr.rel (!%p20_p3) target bundleno = 8 (0x8), region = 97 }
 0x374   :  { %871 = vsyncpa [#allocation3], 1 }
 0x375   :  { %873 = vsyncpa [#allocation3 + $0x1], 1 }
 0x376   :  { %874 = vsyncpa [#allocation6], 1 }
 0x377   :  { %875 = vsyncpa [#allocation4], 1 }
 0x378   :  { %877 = vsyncpa [#allocation4 + $0x1], 1 }

</bundles_post_ra>
